<compile_context>
chip_gen: v6e
topology: v6e:2x2x1
jax: 0.10.0
libtpu: 0.0.40
codegen_flags: <defaults>
</compile_context>

<pallas_src>
import jax
import jax.numpy as jnp
from jax.experimental import pallas as pl
from jax.experimental.pallas import tpu as pltpu


def _round_up(n, m):
    return ((n + m - 1) // m) * m


def _mlp_kernel(x_ref, w1_ref, b1_ref, w2_ref, b2_ref, forgot_ref, day_ref):
    # x: (tb, 4)  w1: (4, 64)  b1: (1, 64)  w2: (64, C)  b2: (1, C)
    x = x_ref[...]
    w1 = w1_ref[...]
    # Layer 1 as 4 broadcast multiply-adds on the VPU (a K=4 MXU contraction
    # would be ~3% utilized). BatchNorm is already folded into w1/b1.
    h = x[:, 0:1] * w1[0:1, :]
    for k in range(1, 4):
        h = h + x[:, k:k + 1] * w1[k:k + 1, :]
    h = h + b1_ref[...]
    # ReLU; Dropout(0.4) is identity in eval mode.
    h = jnp.maximum(h, 0.0)
    # Layer 2 on the MXU: (tb, 64) @ (64, C), f32 accumulation.
    out = jnp.dot(h, w2_ref[...], preferred_element_type=jnp.float32)
    out = out + b2_ref[...]
    # Split inside the kernel so the wrapper never slices (no extra HBM pass).
    forgot_ref[...] = out[:, 0:1]
    day_ref[...] = out[:, 1:]


def _fold_bn(params):
    """Fold BatchNorm1d (eval) affine into the first Linear's weights/bias."""
    w1, b1, g, beta, mean, var, w2, b2 = params
    eps = 1e-5
    scale = g / jnp.sqrt(var + eps)
    shift = beta - mean * scale
    w1_f = (w1 * scale[None, :]).astype(jnp.float32)
    b1_f = (b1 * scale + shift).astype(jnp.float32)
    return w1_f, b1_f, w2.astype(jnp.float32), b2.astype(jnp.float32)


def _xla_forward(x, params):
    """Plain-XLA fallback for tiny batches (pallas_call is pure overhead there)."""
    w1_f, b1_f, w2, b2 = _fold_bn(params)
    h = jnp.maximum(x.astype(jnp.float32) @ w1_f + b1_f, 0.0)
    out = h @ w2 + b2
    return out[:, 0], out[:, 1:]


def _pick_tile(B, batch_tile):
    if B <= 8:
        return 8
    # Balance tiles (minimal ragged waste) and keep >=2 tiles so the "parallel"
    # batch axis can shard across v7x's two TensorCores.
    nt = max(pl.cdiv(B, batch_tile), 2)
    return _round_up(pl.cdiv(B, nt), 8)


def model_forward(x, params, *, batch_tile=1024, xla_fallback_below=0):
    """Returns (forgot [B], forgot_day [B, C-1]) matching the PyTorch forward."""
    B = x.shape[0]
    if B < xla_fallback_below:
        return _xla_forward(x, params)

    w1_f, b1_f, w2_f, b2_f = _fold_bn(params)
    H = w1_f.shape[1]          # 64
    C = w2_f.shape[1]          # num_classes (>= 2 per the module's split)
    b1_f = b1_f.reshape(1, H)
    b2_f = b2_f.reshape(1, C)
    x = x.astype(jnp.float32)

    tb = _pick_tile(B, batch_tile)
    grid = (pl.cdiv(B, tb),)   # ragged final tile handled by Pallas (row-wise op)

    flops = 2 * B * (4 * H + H * C)
    bytes_accessed = 4 * (B * 4 + B * C
                          + w1_f.size + b1_f.size + w2_f.size + b2_f.size)

    forgot, forgot_day = pl.pallas_call(
        _mlp_kernel,
        out_shape=(jax.ShapeDtypeStruct((B, 1), jnp.float32),
                   jax.ShapeDtypeStruct((B, C - 1), jnp.float32)),
        grid=grid,
        in_specs=[
            pl.BlockSpec((tb, 4), lambda i: (i, 0)),     # x streams per tile
            pl.BlockSpec((4, H), lambda i: (0, 0)),      # w1 resident
            pl.BlockSpec((1, H), lambda i: (0, 0)),      # b1 resident
            pl.BlockSpec((H, C), lambda i: (0, 0)),      # w2 resident
            pl.BlockSpec((1, C), lambda i: (0, 0)),      # b2 resident
        ],
        out_specs=(pl.BlockSpec((tb, 1), lambda i: (i, 0)),
                   pl.BlockSpec((tb, C - 1), lambda i: (i, 0))),
        compiler_params=pltpu.CompilerParams(
            dimension_semantics=("parallel",)),
        cost_estimate=pl.CostEstimate(
            flops=flops, transcendentals=0, bytes_accessed=bytes_accessed),
    )(x, w1_f, b1_f, w2_f, b2_f)

    return forgot.reshape(B), forgot_day


def init_params(key, num_classes):
    """Deterministic parameter init matching the PyTorch module's shapes."""
    k1, k2, k3, k4, k5, k6 = jax.random.split(key, 6)
    # Linear(4, 64): torch weight (64, 4) -> stored transposed (4, 64)
    w1 = jax.random.normal(k1, (4, 64), jnp.float32) * 0.1
    b1 = jax.random.normal(k2, (64,), jnp.float32) * 0.01
    # BatchNorm1d(64)
    bn_gamma = jnp.ones((64,), jnp.float32)
    bn_beta = jnp.zeros((64,), jnp.float32)
    bn_mean = jax.random.normal(k3, (64,), jnp.float32) * 0.05
    bn_var = jnp.abs(jax.random.normal(k4, (64,), jnp.float32)) * 0.1 + 1.0
    # Linear(64, num_classes): stored transposed (64, C)
    w2 = jax.random.normal(k5, (64, num_classes), jnp.float32) * 0.1
    b2 = jax.random.normal(k6, (num_classes,), jnp.float32) * 0.01
    return (w1, b1, bn_gamma, bn_beta, bn_mean, bn_var, w2, b2)


def _reference(x, params):
    w1, b1, g, b, m, v, w2, b2 = params
    h = x @ w1 + b1
    h = (h - m) / jnp.sqrt(v + 1e-5) * g + b
    h = jnp.maximum(h, 0.0)
    out = h @ w2 + b2
    return out[:, 0], out[:, 1:]


if __name__ == "__main__":
    key = jax.random.PRNGKey(0)
    kx, kp, kx2 = jax.random.split(key, 3)

    batch = 8
    num_classes = 8
    x = jax.random.normal(kx, (batch, 4), jnp.float32)
    params = init_params(kp, num_classes)

    forgot, forgot_day = model_forward(x, params)
    jax.block_until_ready((forgot, forgot_day))

    assert forgot.shape == (batch,)
    assert forgot_day.shape == (batch, num_classes - 1)

    ref_f, ref_d = _reference(x, params)
    assert jnp.allclose(forgot, ref_f, atol=2e-5)
    assert jnp.allclose(forgot_day, ref_d, atol=2e-5)

    # Exercise the multi-tile grid with a ragged final tile (no wrapper padding).
    batch2 = 600
    x2 = jax.random.normal(kx2, (batch2, 4), jnp.float32)
    forgot2, forgot_day2 = model_forward(x2, params, batch_tile=256)
    jax.block_until_ready((forgot2, forgot_day2))
    ref_f2, ref_d2 = _reference(x2, params)
    assert forgot2.shape == (batch2,)
    assert forgot_day2.shape == (batch2, num_classes - 1)
    assert jnp.allclose(forgot2, ref_f2, atol=2e-5)
    assert jnp.allclose(forgot_day2, ref_d2, atol=2e-5)

    print("KERNEL_OK")
</pallas_src>

<mosaic_0001>
module attributes {stable_mosaic.version = 11 : i64} {
  func.func @_mlp_kernel(%arg0: i32, %arg1: memref<8x4xf32, #tpu.memory_space<vmem>>, %arg2: memref<4x64xf32, #tpu.memory_space<vmem>>, %arg3: memref<1x64xf32, #tpu.memory_space<vmem>>, %arg4: memref<64x8xf32, #tpu.memory_space<vmem>>, %arg5: memref<1x8xf32, #tpu.memory_space<vmem>>, %arg6: memref<8x1xf32, #tpu.memory_space<vmem>>, %arg7: memref<8x7xf32, #tpu.memory_space<vmem>>) attributes {dimension_semantics = [#tpu.dimension_semantics<parallel>], iteration_bounds = array<i64: 1>, scalar_prefetch = 0 : i64, scratch_operands = 0 : i64, tpu.core_type = #tpu.core_type<tc>, window_params = [{transform_indices = @transform_0, window_bounds = array<i64: 8, 4>}, {pipeline_mode = #tpu.pipeline_mode<synchronous>, transform_indices = @transform_1, window_bounds = array<i64: 4, 64>}, {pipeline_mode = #tpu.pipeline_mode<synchronous>, transform_indices = @transform_2, window_bounds = array<i64: 1, 64>}, {pipeline_mode = #tpu.pipeline_mode<synchronous>, transform_indices = @transform_3, window_bounds = array<i64: 64, 8>}, {pipeline_mode = #tpu.pipeline_mode<synchronous>, transform_indices = @transform_4, window_bounds = array<i64: 1, 8>}, {transform_indices = @transform_5, window_bounds = array<i64: 8, 1>}, {transform_indices = @transform_6, window_bounds = array<i64: 8, 7>}]} {
    %c0 = arith.constant 0 : index
    %c0_0 = arith.constant 0 : index
    %0 = vector.load %arg1[%c0, %c0_0] : memref<8x4xf32, #tpu.memory_space<vmem>>, vector<8x4xf32>
    %c0_1 = arith.constant 0 : index
    %c0_2 = arith.constant 0 : index
    %1 = vector.load %arg2[%c0_1, %c0_2] : memref<4x64xf32, #tpu.memory_space<vmem>>, vector<4x64xf32>
    %2 = vector.extract_strided_slice %0 {offsets = [0, 0], sizes = [8, 1], strides = [1, 1]} : vector<8x4xf32> to vector<8x1xf32>
    %3 = vector.extract_strided_slice %1 {offsets = [0, 0], sizes = [1, 64], strides = [1, 1]} : vector<4x64xf32> to vector<1x64xf32>
    %4 = vector.broadcast %2 : vector<8x1xf32> to vector<8x64xf32>
    %5 = vector.broadcast %3 : vector<1x64xf32> to vector<8x64xf32>
    %6 = arith.mulf %4, %5 : vector<8x64xf32>
    %7 = vector.extract_strided_slice %0 {offsets = [0, 1], sizes = [8, 1], strides = [1, 1]} : vector<8x4xf32> to vector<8x1xf32>
    %8 = vector.extract_strided_slice %1 {offsets = [1, 0], sizes = [1, 64], strides = [1, 1]} : vector<4x64xf32> to vector<1x64xf32>
    %9 = vector.broadcast %7 : vector<8x1xf32> to vector<8x64xf32>
    %10 = vector.broadcast %8 : vector<1x64xf32> to vector<8x64xf32>
    %11 = arith.mulf %9, %10 : vector<8x64xf32>
    %12 = arith.addf %6, %11 : vector<8x64xf32>
    %13 = vector.extract_strided_slice %0 {offsets = [0, 2], sizes = [8, 1], strides = [1, 1]} : vector<8x4xf32> to vector<8x1xf32>
    %14 = vector.extract_strided_slice %1 {offsets = [2, 0], sizes = [1, 64], strides = [1, 1]} : vector<4x64xf32> to vector<1x64xf32>
    %15 = vector.broadcast %13 : vector<8x1xf32> to vector<8x64xf32>
    %16 = vector.broadcast %14 : vector<1x64xf32> to vector<8x64xf32>
    %17 = arith.mulf %15, %16 : vector<8x64xf32>
    %18 = arith.addf %12, %17 : vector<8x64xf32>
    %19 = vector.extract_strided_slice %0 {offsets = [0, 3], sizes = [8, 1], strides = [1, 1]} : vector<8x4xf32> to vector<8x1xf32>
    %20 = vector.extract_strided_slice %1 {offsets = [3, 0], sizes = [1, 64], strides = [1, 1]} : vector<4x64xf32> to vector<1x64xf32>
    %21 = vector.broadcast %19 : vector<8x1xf32> to vector<8x64xf32>
    %22 = vector.broadcast %20 : vector<1x64xf32> to vector<8x64xf32>
    %23 = arith.mulf %21, %22 : vector<8x64xf32>
    %24 = arith.addf %18, %23 : vector<8x64xf32>
    %c0_3 = arith.constant 0 : index
    %c0_4 = arith.constant 0 : index
    %25 = vector.load %arg3[%c0_3, %c0_4] : memref<1x64xf32, #tpu.memory_space<vmem>>, vector<1x64xf32>
    %26 = vector.broadcast %25 : vector<1x64xf32> to vector<8x64xf32>
    %27 = arith.addf %24, %26 : vector<8x64xf32>
    %cst = arith.constant 0.000000e+00 : f32
    %28 = vector.broadcast %cst : f32 to vector<8x64xf32>
    %29 = arith.maximumf %27, %28 : vector<8x64xf32>
    %c0_5 = arith.constant 0 : index
    %c0_6 = arith.constant 0 : index
    %30 = vector.load %arg4[%c0_5, %c0_6] : memref<64x8xf32, #tpu.memory_space<vmem>>, vector<64x8xf32>
    %cst_7 = arith.constant dense<0.000000e+00> : vector<8x8xf32>
    %31 = tpu.matmul %29, %30, %cst_7 {dimension_numbers = #tpu.dot_dimension_numbers<[1], [0], [0], [1], [0, 0, 1, 1], [], []>} : vector<8x64xf32>, vector<64x8xf32>, vector<8x8xf32> -> vector<8x8xf32>
    %c0_8 = arith.constant 0 : index
    %c0_9 = arith.constant 0 : index
    %32 = vector.load %arg5[%c0_8, %c0_9] : memref<1x8xf32, #tpu.memory_space<vmem>>, vector<1x8xf32>
    %33 = vector.broadcast %32 : vector<1x8xf32> to vector<8x8xf32>
    %34 = arith.addf %31, %33 : vector<8x8xf32>
    %35 = vector.extract_strided_slice %34 {offsets = [0, 0], sizes = [8, 1], strides = [1, 1]} : vector<8x8xf32> to vector<8x1xf32>
    %c0_10 = arith.constant 0 : index
    %c0_11 = arith.constant 0 : index
    %36 = vector.load %arg6[%c0_10, %c0_11] : memref<8x1xf32, #tpu.memory_space<vmem>>, vector<8x1xf32>
    tpu.vector_store %arg6[%c0_10, %c0_11], %35 {strides = array<i32>} : memref<8x1xf32, #tpu.memory_space<vmem>>, vector<8x1xf32>,
    %37 = vector.extract_strided_slice %34 {offsets = [0, 1], sizes = [8, 7], strides = [1, 1]} : vector<8x8xf32> to vector<8x7xf32>
    %c0_12 = arith.constant 0 : index
    %c0_13 = arith.constant 0 : index
    %38 = vector.load %arg7[%c0_12, %c0_13] : memref<8x7xf32, #tpu.memory_space<vmem>>, vector<8x7xf32>
    tpu.vector_store %arg7[%c0_12, %c0_13], %37 {strides = array<i32>} : memref<8x7xf32, #tpu.memory_space<vmem>>, vector<8x7xf32>,
    return
  }
  func.func @transform_0(%arg0: i32) -> (i32, i32) {
    %c0_i32 = arith.constant 0 : i32
    %c0_i32_0 = arith.constant 0 : i32
    return %arg0, %c0_i32 : i32, i32
  }
  func.func @transform_1(%arg0: i32) -> (i32, i32) {
    %c0_i32 = arith.constant 0 : i32
    %c0_i32_0 = arith.constant 0 : i32
    %c0_i32_1 = arith.constant 0 : i32
    return %c0_i32, %c0_i32_0 : i32, i32
  }
  func.func @transform_2(%arg0: i32) -> (i32, i32) {
    %c0_i32 = arith.constant 0 : i32
    %c0_i32_0 = arith.constant 0 : i32
    %c0_i32_1 = arith.constant 0 : i32
    return %c0_i32, %c0_i32_0 : i32, i32
  }
  func.func @transform_3(%arg0: i32) -> (i32, i32) {
    %c0_i32 = arith.constant 0 : i32
    %c0_i32_0 = arith.constant 0 : i32
    %c0_i32_1 = arith.constant 0 : i32
    return %c0_i32, %c0_i32_0 : i32, i32
  }
  func.func @transform_4(%arg0: i32) -> (i32, i32) {
    %c0_i32 = arith.constant 0 : i32
    %c0_i32_0 = arith.constant 0 : i32
    %c0_i32_1 = arith.constant 0 : i32
    return %c0_i32, %c0_i32_0 : i32, i32
  }
  func.func @transform_5(%arg0: i32) -> (i32, i32) {
    %c0_i32 = arith.constant 0 : i32
    %c0_i32_0 = arith.constant 0 : i32
    return %arg0, %c0_i32 : i32, i32
  }
  func.func @transform_6(%arg0: i32) -> (i32, i32) {
    %c0_i32 = arith.constant 0 : i32
    %c0_i32_0 = arith.constant 0 : i32
    return %arg0, %c0_i32 : i32, i32
  }
}

</mosaic_0001>

<bundles_post_ra>
// kernel: tpu_custom_call.1
= control target key start
LH: loop header
LB: loop body
LE: loop exit
PB: predicated region body
PF: predicated region fallthrough
CT: control target
= control target key end

     0   :  { %v255_v1 = vmov 0   ;;  %v256_v2 = vmov 2   ;;  %s340_s0 = inlined_call_operand.vmem [shape: f32[8,4], index: 0, kind: input, shape index: {}]   ;;  %s341_s1 = inlined_call_operand.vmem [shape: f32[4,64], index: 1, kind: input, shape index: {}]   ;;  %s342_s2 = inlined_call_operand.vmem [shape: f32[1,64], index: 2, kind: input, shape index: {}]   ;;  %s343_s3 = inlined_call_operand.vmem [shape: f32[64,8], index: 3, kind: input, shape index: {}]   ;;  %s344_s4 = inlined_call_operand.vmem [shape: f32[1,8], index: 4, kind: input, shape index: {}]   ;;  %s345_s5 = inlined_call_operand.vmem [shape: f32[8,1], index: 5, kind: output, shape index: {0}]   ;;  %s346_s6 = inlined_call_operand.hbm [shape: f32[8,7], index: 6, kind: output, shape index: {1}]  }
   0x1   :  { %v23_v0 = vld [vmem:[%s340_s0] sm:$0xff]  ;;  %228 = vset.pattern.permute.xlu0 %v255_v1  ;;  %230 = vset.pattern.permute.xlu1 %v256_v2  ;;  %v81_v3 = vld [vmem:[%s343_s3 + $0x38] sm:$0xff] }
   0x2   :  { %12 = vsyncpa [#allocation3], 0  ;;  %27 = vperm.xlu0 %228, %v23_v0   ;;  %46 = vperm.xlu1 %230, %v23_v0   ;;  %v257_v4 = vmov 0.0   ;;  %v80_v5 = vld [vmem:[%s343_s3 + $0x30] sm:$0xff]  ;;  %v258_v6 = vmov 1   ;;  %v259_v7 = vmov 3   ;;  %v30_v14 = vlaneseq }
   0x3   :  { %201 = vmatprep.subr.mxu0 %v257_v4  ;;  %v79_v8 = vld [vmem:[%s343_s3 + $0x28] sm:$0xff]  ;;  %v78_v9 = vld [vmem:[%s343_s3 + $0x20] sm:$0xff]  ;;  %v77_v10 = vld [vmem:[%s343_s3 + $0x18] sm:$0xff]  ;;  %vm260_vm0 = vmmov 0   ;;  %vm89_vm1 = vcmask 523264   ;;  %vm163_vm2 = vcmask 7168  }
   0x4   :  { %202 = vmatpush3.msra.mxu0 %v81_v3  ;;  %v76_v11 = vld [vmem:[%s343_s3 + $0x10] sm:$0xff]  ;;  %217 = vmatprep.mubr.msk.f32.mxu0 %vm260_vm0, %v257_v4  ;;  %v75_v12 = vld [vmem:[%s343_s3 + $0x8] sm:$0xff]  ;;  %v74_v13 = vld [vmem:[%s343_s3] sm:$0xff]  ;;  %v31_v15 = vshrl.u32 %v30_v14, 7  ;;  %s261_s20 = smov 127   ;;  %vm169_vm3 = vcmask 56320  }
   0x5   :  { %203 = vmatprep.subr.mxu0 %v257_v4  ;;  %v24_v18 = vld [vmem:[%s341_s1] sm:$0xf] }
   0x6   :  { %229 = vset.pattern.permute.xlu0 %v258_v6  ;;  %231 = vset.pattern.permute.xlu1 %v259_v7  ;;  %v32_v16 = vsub.s32 0, %v31_v15  ;;  %v41_v17 = vsub.s32 1, %v31_v15  ;;  %v51_v20 = vsub.s32 2, %v31_v15  ;;  %v61_v22 = vsub.s32 3, %v31_v15  ;;  %v189_v35 = vld [vmem:[%s342_s2] ss:$0 sm:$0xff] }
   0x7   :  { %36 = vperm.xlu0 %229, %v23_v0   ;;  %56 = vperm.xlu1 %231, %v23_v0   ;;  %v190_v39 = vld [vmem:[%s344_s4] ss:$0 sm:$0xff]  ;;  %s262_s2 = smov [#allocation2]  }
   0x8   :  { %204 = vmatpush3.msra.mxu0 %v80_v5  ;;  %v33_v23 = vrot.slane %v24_v18, %v32_v16  ;;  %v42_v24 = vrot.slane %v24_v18, %v41_v17  ;;  %v52_v25 = vrot.slane %v24_v18, %v51_v20  ;;  %v62_v26 = vrot.slane %v24_v18, %v61_v22  ;;  %s179_s21 = sshll.u32 %s262_s2, 4  ;;  %s180_s21 = int_to_ptr.vmem [resolvable:$true] %s179_s21 }
   0x9   :  { %205 = vmatprep.subr.mxu0 %v257_v4  ;;  %s233_s22 = scalar_lea.vmem %s180_s21, 128  ;;  %p238_p1 = scmp.lt.s32.totalorder %s180_s21, %s180_s21 }
   0xa   :  { %206 = vmatpush3.msra.mxu0 %v79_v8  ;;  %p234_p0 = scmp.ne.s32.totalorder %s180_s21, %s233_s22  ;;  %p239_p2 = scmp.lt.s32.totalorder %s233_s22, %s233_s22 }
   0xb   :  { %207 = vmatprep.subr.mxu0 %v257_v4  ;;  %232 = vset.pattern.permute.xlu0 %v259_v7 }
   0xc   :  { %208 = vmatpush3.msra.mxu0 %v78_v9  ;;  %p240_p3 = por %p239_p2, %p238_p1 }
   0xd   :  { %209 = vmatprep.subr.mxu0 %v257_v4 }
   0xe   :  { %210 = vmatpush3.msra.mxu0 %v77_v10  ;;  %p241_p4 = pnand %p240_p3, %p234_p0 }
   0xf   :  { %211 = vmatprep.subr.mxu0 %v257_v4 }
  0x10   :  { %212 = vmatpush3.msra.mxu0 %v76_v11 }
  0x11   :  { %213 = vmatprep.subr.mxu0 %v257_v4 }
  0x12   :  { %214 = vmatpush3.msra.mxu0 %v75_v12 }
  0x13   :  { %215 = vmatprep.subr.mxu0 %v257_v4 }
  0x14   :  { %216 = vmatpush3.msra.mxu0 %v74_v13 }
  0x7d   :  { %v28_v19 = vpop.permute.xlu0 %27  ;;  %v47_v21 = vpop.permute.xlu1 %46 }
  0x7e   :  { %v34_v29 = vmul.f32 %v33_v23, %v28_v19  ;;  %v53_v31 = vmul.f32 %v52_v25, %v47_v21 }
  0x82   :  { %v37_v27 = vpop.permute.xlu0 %36  ;;  %v57_v28 = vpop.permute.xlu1 %56 }
  0x83   :  { %v43_v30 = vmul.f32 %v42_v24, %v37_v27  ;;  %v63_v33 = vmul.f32 %v62_v26, %v57_v28 }
  0x85   :  { %v44_v32 = vadd.f32 %v43_v30, %v34_v29 }
  0x87   :  { %v54_v34 = vadd.f32 %v53_v31, %v44_v32 }
  0x89   :  { %v64_v36 = vadd.f32 %v63_v33, %v54_v34 }
  0x8b   :  { %v72_v37 = vadd.f32 %v189_v35, %v64_v36 }
  0x8d   :  { %v73_v38 = vmax.f32 %v72_v37, 0.0 }
  0x8f   :  { %218 = vmatmul.mubr.msk.f32.vlgmr.msra.gmra.mxu0 %vm89_vm1, %v73_v38 }
 0x14f   :  { %v159_v40 = vpop.f32.mrf.mxu0 }
 0x150   :  { %v160_v41 = vadd.f32 %v190_v39, %v159_v40 }
 0x151   :  { %v219_v42 = vpop.f32.mrf.mxu0 }
 0x152   :  { %164 = vst.msk [vmem:[%s345_s5] sm:$0xff] %vm163_vm2, %v160_v41  ;;  %166 = vrot.lane.b32.xlu1 %v160_v41, %s261_s20 }
 0x1c4   :  { %v167_v43 = vpop.permute.xlu1 %166 }
 0x1c5   :  { %170 = vst.msk [vmem:[#allocation2] sm:$0xff] %vm169_vm3, %v167_v43 }
 0x1c6   :  { %244 = shalt.err (!%p241_p4)
}
 0x1c7   :  { %182 = dma.vmem_to_hbm [thread:$0]  %s180_s21, 128, %s346_s6, [#allocation3]  }
 0x1c8   :  { %253 = dma.done.wait [#allocation3], 128  }
 0x1c9   :  { %254 = vsyncadd [#allocation3], 4294967168 }
 0x1ca   :  { %188 = vsyncpa [#allocation3], 1 }

</bundles_post_ra>
